<compile_context>
chip_gen: v6e
topology: v6e:2x2x1
jax: 0.10.0
libtpu: 0.0.40
codegen_flags: <defaults>
</compile_context>

<pallas_src>
import functools
import math

import jax
import jax.numpy as jnp
from jax import lax
from jax.experimental import pallas as pl
from jax.experimental.pallas import tpu as pltpu

T_VALID = 1e-4
EPS = 1e-8
_LANE = 128
_SUBLANE = 8


def _l2loss_kernel(pred_ref, gt_ref, d_ref, n_ref, *, max_depth, n_rows, tile_r):
    """Accumulate per-batch partial sums of (pred-gt)^2*mask and mask.

    Block shapes:
      pred_ref, gt_ref : (1, tile_r, 128)  chunk `k` of flattened sample `b`
      d_ref, n_ref     : (1, 8, 128)       resident per-batch accumulators
    Grid: (B, K) — K is the sequential ("arbitrary") chunk axis.
    """
    k = pl.program_id(1)

    @pl.when(k == 0)
    def _():
        d_ref[...] = jnp.zeros_like(d_ref)
        n_ref[...] = jnp.zeros_like(n_ref)

    pred = pred_ref[0].astype(jnp.float32)   # (tile_r, 128)
    gt = gt_ref[0].astype(jnp.float32)

    # Ragged tail: rows at/after n_rows are out-of-bounds block padding.
    row_idx = k * tile_r + lax.broadcasted_iota(jnp.int32, (tile_r, _LANE), 0)
    in_bounds = row_idx < n_rows

    gt_c = jnp.clip(gt, 0.0, max_depth)
    pred_c = jnp.clip(pred, 0.0, max_depth)
    valid = jnp.logical_and(gt_c > T_VALID, in_bounds)

    diff = pred_c - gt_c
    d_part = jnp.where(valid, diff * diff, 0.0)   # where(): robust to garbage/NaN pad
    n_part = jnp.where(valid, 1.0, 0.0)

    # Fold the (tile_r, 128) chunk into the resident (8, 128) accumulator:
    # sum over the leading (non-tiled) axis = pure VPU vreg adds, no XLU.
    d_fold = jnp.sum(d_part.reshape(tile_r // _SUBLANE, _SUBLANE, _LANE), axis=0)
    n_fold = jnp.sum(n_part.reshape(tile_r // _SUBLANE, _SUBLANE, _LANE), axis=0)
    d_ref[...] += d_fold[None, :, :]
    n_ref[...] += n_fold[None, :, :]


def l2loss_depth(pred, gt, *, max_depth=10.0, tile_rows=1024):
    """Scalar L2 loss (mode='depth') matching the PyTorch L2Loss module."""
    assert pred.shape == gt.shape
    B = pred.shape[0]
    N = math.prod(pred.shape[1:])

    # Flatten each sample.  Zero-padding is mask-neutral (gt=0 -> mask=0) but
    # costs an HBM copy, so only pad when N is not lane-aligned or too small;
    # the common case (N % 128 == 0, N >= 1024) reshapes with no copy.
    pad = (-N) % _LANE
    if N + pad < _SUBLANE * _LANE:
        pad = _SUBLANE * _LANE - N
    pred_f = jnp.reshape(pred, (B, N))
    gt_f = jnp.reshape(gt, (B, N))
    if pad:
        pred_f = jnp.pad(pred_f, ((0, 0), (0, pad)))
        gt_f = jnp.pad(gt_f, ((0, 0), (0, pad)))
    Np = N + pad
    R = Np // _LANE
    pred_f = jnp.reshape(pred_f, (B, R, _LANE))
    gt_f = jnp.reshape(gt_f, (B, R, _LANE))

    # Chunk the reduction axis: tile_r rows (multiple of 8, <= R) per step so
    # input blocks stay ~0.5 MiB f32 independent of C*H*W.
    tile_r = min(int(tile_rows), (R // _SUBLANE) * _SUBLANE)
    tile_r = max(tile_r, _SUBLANE)
    K = pl.cdiv(R, tile_r)

    kernel = functools.partial(
        _l2loss_kernel, max_depth=float(max_depth), n_rows=R, tile_r=tile_r)

    d_out, n_out = pl.pallas_call(
        kernel,
        out_shape=(
            jax.ShapeDtypeStruct((B, _SUBLANE, _LANE), jnp.float32),
            jax.ShapeDtypeStruct((B, _SUBLANE, _LANE), jnp.float32),
        ),
        grid_spec=pltpu.PrefetchScalarGridSpec(
            num_scalar_prefetch=0,
            grid=(B, K),
            in_specs=[
                pl.BlockSpec((1, tile_r, _LANE), lambda b, k: (b, k, 0)),
                pl.BlockSpec((1, tile_r, _LANE), lambda b, k: (b, k, 0)),
            ],
            out_specs=[
                pl.BlockSpec((1, _SUBLANE, _LANE), lambda b, k: (b, 0, 0)),
                pl.BlockSpec((1, _SUBLANE, _LANE), lambda b, k: (b, 0, 0)),
            ],
        ),
        compiler_params=pltpu.CompilerParams(
            dimension_semantics=("parallel", "arbitrary")),
    )(pred_f, gt_f)

    # Finalize (tiny): per-batch totals and the single divide per batch.
    d = jnp.sum(d_out, axis=(1, 2))
    n = jnp.sum(n_out, axis=(1, 2))
    return jnp.sum(d / (n + EPS))


def _reference(pred, gt, max_depth):
    gt = jnp.clip(gt, 0.0, max_depth)
    pred = jnp.clip(pred, 0.0, max_depth)
    mask = (gt > T_VALID).astype(pred.dtype)
    d = (pred - gt) ** 2 * mask
    d = jnp.sum(d, axis=(1, 2, 3))
    n = jnp.sum(mask, axis=(1, 2, 3))
    return jnp.sum(d / (n + EPS))


if __name__ == "__main__":
    key = jax.random.PRNGKey(0)
    k1, k2 = jax.random.split(key)

    B, C, H, W = 2, 4, 16, 16  # NCHW, consistent with the PyTorch module
    max_depth = 10.0

    # depth-like inputs: values below t_valid / negative / above max_depth to
    # exercise both the clamp and the validity mask
    pred = jax.random.uniform(k1, (B, C, H, W), jnp.float32, -1.0, 12.0)
    gt = jax.random.uniform(k2, (B, C, H, W), jnp.float32, -1.0, 12.0)

    loss = jax.block_until_ready(l2loss_depth(pred, gt, max_depth=max_depth))

    ref = _reference(pred, gt, max_depth)
    assert jnp.allclose(loss, ref, rtol=1e-5, atol=1e-5), (loss, ref)

    print("KERNEL_OK")
</pallas_src>

<mosaic_0001>
module attributes {stable_mosaic.version = 11 : i64} {
  func.func @_l2loss_kernel(%arg0: i32, %arg1: i32, %arg2: memref<1x8x128xf32, #tpu.memory_space<vmem>>, %arg3: memref<1x8x128xf32, #tpu.memory_space<vmem>>, %arg4: memref<1x8x128xf32, #tpu.memory_space<vmem>>, %arg5: memref<1x8x128xf32, #tpu.memory_space<vmem>>) attributes {dimension_semantics = [#tpu.dimension_semantics<parallel>, #tpu.dimension_semantics<arbitrary>], iteration_bounds = array<i64: 2, 1>, scalar_prefetch = 0 : i64, scratch_operands = 0 : i64, tpu.core_type = #tpu.core_type<tc>, window_params = [{transform_indices = @transform_0, window_bounds = array<i64: 1, 8, 128>}, {transform_indices = @transform_1, window_bounds = array<i64: 1, 8, 128>}, {transform_indices = @transform_2, window_bounds = array<i64: 1, 8, 128>}, {transform_indices = @transform_3, window_bounds = array<i64: 1, 8, 128>}]} {
    %c0_i32 = arith.constant 0 : i32
    %0 = arith.cmpi eq, %arg1, %c0_i32 : i32
    %1 = arith.extui %0 : i1 to i32
    %c0_i32_0 = arith.constant 0 : i32
    %2 = arith.cmpi ne, %1, %c0_i32_0 : i32
    scf.if %2 {
      %cst_28 = arith.constant 0.000000e+00 : f32
      %43 = vector.broadcast %cst_28 : f32 to vector<1x8x128xf32>
      %c0_29 = arith.constant 0 : index
      %c0_30 = arith.constant 0 : index
      %c0_31 = arith.constant 0 : index
      %44 = vector.load %arg4[%c0_29, %c0_30, %c0_31] : memref<1x8x128xf32, #tpu.memory_space<vmem>>, vector<1x8x128xf32>
      tpu.vector_store %arg4[%c0_29, %c0_30, %c0_31], %43 {strides = array<i32>} : memref<1x8x128xf32, #tpu.memory_space<vmem>>, vector<1x8x128xf32>,
      %cst_32 = arith.constant 0.000000e+00 : f32
      %45 = vector.broadcast %cst_32 : f32 to vector<1x8x128xf32>
      %c0_33 = arith.constant 0 : index
      %c0_34 = arith.constant 0 : index
      %c0_35 = arith.constant 0 : index
      %46 = vector.load %arg5[%c0_33, %c0_34, %c0_35] : memref<1x8x128xf32, #tpu.memory_space<vmem>>, vector<1x8x128xf32>
      tpu.vector_store %arg5[%c0_33, %c0_34, %c0_35], %45 {strides = array<i32>} : memref<1x8x128xf32, #tpu.memory_space<vmem>>, vector<1x8x128xf32>,
    } else {
    }
    %c0 = arith.constant 0 : index
    %c0_1 = arith.constant 0 : index
    %c0_2 = arith.constant 0 : index
    %3 = vector.load %arg2[%c0, %c0_1, %c0_2] : memref<1x8x128xf32, #tpu.memory_space<vmem>>, vector<1x8x128xf32>
    %4 = vector.shape_cast %3 : vector<1x8x128xf32> to vector<8x128xf32>
    %c0_3 = arith.constant 0 : index
    %c0_4 = arith.constant 0 : index
    %c0_5 = arith.constant 0 : index
    %5 = vector.load %arg3[%c0_3, %c0_4, %c0_5] : memref<1x8x128xf32, #tpu.memory_space<vmem>>, vector<1x8x128xf32>
    %6 = vector.shape_cast %5 : vector<1x8x128xf32> to vector<8x128xf32>
    %c8_i32 = arith.constant 8 : i32
    %7 = arith.muli %arg1, %c8_i32 : i32
    %8 = tpu.iota {dimensions = array<i32: 0>} : vector<8x128xi32>
    %9 = vector.broadcast %7 : i32 to vector<8x128xi32>
    %10 = arith.addi %9, %8 : vector<8x128xi32>
    %c8_i32_6 = arith.constant 8 : i32
    %11 = vector.broadcast %c8_i32_6 : i32 to vector<8x128xi32>
    %12 = arith.cmpi slt, %10, %11 : vector<8x128xi32>
    %cst = arith.constant 0.000000e+00 : f32
    %cst_7 = arith.constant 1.000000e+01 : f32
    %13 = vector.broadcast %cst : f32 to vector<8x128xf32>
    %14 = arith.maximumf %13, %6 : vector<8x128xf32>
    %15 = vector.broadcast %cst_7 : f32 to vector<8x128xf32>
    %16 = arith.minimumf %15, %14 : vector<8x128xf32>
    %cst_8 = arith.constant 0.000000e+00 : f32
    %cst_9 = arith.constant 1.000000e+01 : f32
    %17 = vector.broadcast %cst_8 : f32 to vector<8x128xf32>
    %18 = arith.maximumf %17, %4 : vector<8x128xf32>
    %19 = vector.broadcast %cst_9 : f32 to vector<8x128xf32>
    %20 = arith.minimumf %19, %18 : vector<8x128xf32>
    %cst_10 = arith.constant 9.99999974E-5 : f32
    %21 = vector.broadcast %cst_10 : f32 to vector<8x128xf32>
    %22 = arith.cmpf ogt, %16, %21 : vector<8x128xf32>
    %23 = arith.andi %22, %12 : vector<8x128xi1>
    %24 = arith.subf %20, %16 : vector<8x128xf32>
    %25 = arith.mulf %24, %24 : vector<8x128xf32>
    %cst_11 = arith.constant 0.000000e+00 : f32
    %26 = vector.broadcast %cst_11 : f32 to vector<8x128xf32>
    %27 = arith.select %23, %25, %26 : vector<8x128xi1>, vector<8x128xf32>
    %cst_12 = arith.constant 1.000000e+00 : f32
    %cst_13 = arith.constant 0.000000e+00 : f32
    %28 = vector.broadcast %cst_12 : f32 to vector<8x128xf32>
    %29 = vector.broadcast %cst_13 : f32 to vector<8x128xf32>
    %30 = arith.select %23, %28, %29 : vector<8x128xi1>, vector<8x128xf32>
    %31 = vector.shape_cast %27 : vector<8x128xf32> to vector<1x8x128xf32>
    %cst_14 = arith.constant dense<0.000000e+00> : vector<8x128xf32>
    %32 = vector.multi_reduction <add>, %31, %cst_14 [0] : vector<1x8x128xf32> to vector<8x128xf32>
    %33 = vector.shape_cast %30 : vector<8x128xf32> to vector<1x8x128xf32>
    %cst_15 = arith.constant dense<0.000000e+00> : vector<8x128xf32>
    %34 = vector.multi_reduction <add>, %33, %cst_15 [0] : vector<1x8x128xf32> to vector<8x128xf32>
    %c0_16 = arith.constant 0 : index
    %c0_17 = arith.constant 0 : index
    %c0_18 = arith.constant 0 : index
    %35 = vector.load %arg4[%c0_16, %c0_17, %c0_18] : memref<1x8x128xf32, #tpu.memory_space<vmem>>, vector<1x8x128xf32>
    %36 = vector.shape_cast %32 : vector<8x128xf32> to vector<1x8x128xf32>
    %37 = arith.addf %35, %36 : vector<1x8x128xf32>
    %c0_19 = arith.constant 0 : index
    %c0_20 = arith.constant 0 : index
    %c0_21 = arith.constant 0 : index
    %38 = vector.load %arg4[%c0_19, %c0_20, %c0_21] : memref<1x8x128xf32, #tpu.memory_space<vmem>>, vector<1x8x128xf32>
    tpu.vector_store %arg4[%c0_19, %c0_20, %c0_21], %37 {strides = array<i32>} : memref<1x8x128xf32, #tpu.memory_space<vmem>>, vector<1x8x128xf32>,
    %c0_22 = arith.constant 0 : index
    %c0_23 = arith.constant 0 : index
    %c0_24 = arith.constant 0 : index
    %39 = vector.load %arg5[%c0_22, %c0_23, %c0_24] : memref<1x8x128xf32, #tpu.memory_space<vmem>>, vector<1x8x128xf32>
    %40 = vector.shape_cast %34 : vector<8x128xf32> to vector<1x8x128xf32>
    %41 = arith.addf %39, %40 : vector<1x8x128xf32>
    %c0_25 = arith.constant 0 : index
    %c0_26 = arith.constant 0 : index
    %c0_27 = arith.constant 0 : index
    %42 = vector.load %arg5[%c0_25, %c0_26, %c0_27] : memref<1x8x128xf32, #tpu.memory_space<vmem>>, vector<1x8x128xf32>
    tpu.vector_store %arg5[%c0_25, %c0_26, %c0_27], %41 {strides = array<i32>} : memref<1x8x128xf32, #tpu.memory_space<vmem>>, vector<1x8x128xf32>,
    return
  }
  func.func @transform_0(%arg0: i32, %arg1: i32) -> (i32, i32, i32) {
    %c0_i32 = arith.constant 0 : i32
    %c0_i32_0 = arith.constant 0 : i32
    return %arg0, %arg1, %c0_i32 : i32, i32, i32
  }
  func.func @transform_1(%arg0: i32, %arg1: i32) -> (i32, i32, i32) {
    %c0_i32 = arith.constant 0 : i32
    %c0_i32_0 = arith.constant 0 : i32
    return %arg0, %arg1, %c0_i32 : i32, i32, i32
  }
  func.func @transform_2(%arg0: i32, %arg1: i32) -> (i32, i32, i32) {
    %c0_i32 = arith.constant 0 : i32
    %c0_i32_0 = arith.constant 0 : i32
    %c0_i32_1 = arith.constant 0 : i32
    return %arg0, %c0_i32, %c0_i32_0 : i32, i32, i32
  }
  func.func @transform_3(%arg0: i32, %arg1: i32) -> (i32, i32, i32) {
    %c0_i32 = arith.constant 0 : i32
    %c0_i32_0 = arith.constant 0 : i32
    %c0_i32_1 = arith.constant 0 : i32
    return %arg0, %c0_i32, %c0_i32_0 : i32, i32, i32
  }
}

</mosaic_0001>

<bundles_post_ra>
// kernel: tpu_custom_call.1
= control target key start
LH: loop header
LB: loop body
LE: loop exit
PB: predicated region body
PF: predicated region fallthrough
CT: control target
= control target key end

     0   :  { %9 = vsyncpa [#allocation3], 0  ;;  %s951_s0 = inlined_call_operand.hbm [shape: f32[2,8,128], index: 0, kind: input, shape index: {}]   ;;  %s952_s1 = inlined_call_operand.hbm [shape: f32[2,8,128], index: 1, kind: input, shape index: {}]   ;;  %s953_s2 = inlined_call_operand.hbm [shape: f32[2,8,128], index: 2, kind: output, shape index: {0}]   ;;  %s954_s3 = inlined_call_operand.hbm [shape: f32[2,8,128], index: 3, kind: output, shape index: {1}]  }
   0x1   :  { %11 = vsyncpa [#allocation3 + $0x1], 0 }
   0x2   :  { %12 = vsyncpa [#allocation6], 0 }
   0x3   :  { %14 = vsyncpa [#allocation6 + $0x1], 0 }
   0x4   :  { %15 = vsyncpa [#allocation4], 0 }
   0x5   :  { %17 = vsyncpa [#allocation4 + $0x1], 0 }
   0x6   :  { %18 = vsyncpa [#allocation9], 0 }
   0x7   :  { %20 = vsyncpa [#allocation9 + $0x1], 0  ;;  %s740_s12 = smov 0   ;;  %s742_s13 = smov 0  }
   0x8   :  { %s744_s14 = smov 0   ;;  %s746_s15 = smov 0  }
   0x9   :  { %s748_s16 = smov 0   ;;  %s750_s17 = smov 0  }
   0xa LB: > { %s451_s18 = sadd.s32 4294967295, %s713_s17   ;;  %s452_s19 = sadd.s32 4294967294, %s713_s17   ;;  %s713_s17 = sphi %s750_s17, %s26_s17   ;;  %s709_s16 = sphi %s748_s16, %s966_s16   ;;  %s705_s15 = sphi %s746_s15, %s965_s15   ;;  %s701_s14 = sphi %s744_s14, %s964_s14   ;;  %s697_s13 = sphi %s742_s13, %s963_s13   ;;  %s693_s12 = sphi %s740_s12, %s962_s12  }
   0xb   : > { %s38_s20 = sadd.s32 1, %s709_s16  ;;  %s47_s21 = sadd.s32 1, %s701_s14 }
   0xc   : > { %p40_p0 = scmp.ge.s32.totalorder %s38_s20, 2  ;;  %p54_p1 = scmp.ne.s32.totalorder %s701_s14, %s697_s13 }
   0xd   : > { %p55_p2 = scmp.eq.s32.totalorder %s713_s17, 0  ;;  %p60_p3 = scmp.ne.s32.totalorder %s697_s13, %s693_s12 }
   0xe   : > { %s968_s20 = smov (%p40_p0, %s38_s20), 0  ;;  %p61_p5 = scmp.eq.s32.totalorder %s451_s18, 0 }
   0xf   : > { %p781_p4 = por %p55_p2, %p54_p1  ;;  %s42_s23 = ssub.s32 %s709_s16, %s968_s20 }
  0x10   : > { %p112_p6 = scmp.eq.s32.totalorder %s451_s18, 1  ;;  %p45_p7 = scmp.eq.s32.totalorder %s42_s23, 0 }
  0x11   : > { %p787_p8 = por %p61_p5, %p60_p3  ;;  %p118_p10 = scmp.eq.s32.totalorder %s452_s19, 1 }
  0x12   : > { %p791_p9 = por %p112_p6, %p54_p1  ;;  %p492_p13 = scmp.lt.s32.totalorder %s713_s17, 2 }
  0x13   : > { %s796_s26 = scalar_select %p45_p7, %s701_s14, %s47_s21  }
  0x14   : > { %p798_p11 = por %p118_p10, %p60_p3  ;;  %s805_s28 = sand.u32 1, %s701_s14  }
  0x15   : > { %s455_s29 = sshll.u32 %s805_s28, 3  ;;  %s456_s30 = sshll.u32 %s709_s16, 7 }
  0x16   : > { %s174_s6 = scalar_lea.hbm %s951_s0, %s456_s30  ;;  %s168_s7 = scalar_lea.vmem [#allocation2], %s455_s29 }
  0x17   : > { %s176_s8 = sshll.u32 %s168_s7, 4  ;;  %p814_p0 = pnand %p492_p13, %p781_p4  ;;  %s177_s8 = int_to_ptr.vmem [resolvable:$true] %s176_s8 }
  0x18   : > { %p459_p1 = scmp.ge.s32.totalorder %s713_s17, 1  ;;  %p200_p2 = scmp.lt.s32.totalorder %s713_s17, 3 }
  0x19   : > { %s165_s10 = scalar_lea.sflag [#allocation3], %s805_s28  ;;  %p545_p3 = pneg %p814_p0 }
  0x1a   : > { %s556_s11 = scalar_lea.vmem %s177_s8, 128  ;;  %s715_s18 = smov [#allocation2]  }
  0x1b   : > { %p557_p5 = scmp.ne.s32.totalorder %s177_s8, %s556_s11  ;;  %s561_s19 = sshll.u32 %s715_s18, 4  ;;  %s562_s19 = int_to_ptr.vmem [resolvable:$false] %s561_s19 }
  0x1c   : > { %s563_s21 = scalar_lea.vmem %s562_s19, 256  ;;  %p564_p4 = scmp.lt.s32.totalorder %s177_s8, %s562_s19 }
  0x1d   : > { %p559_p6 = pnand %p557_p5, %p545_p3  ;;  %p565_p10 = scmp.lt.s32.totalorder %s563_s21, %s556_s11 }
  0x1f   : > { %p560_p7 = pneg %p559_p6  ;;  %p566_p13 = por %p565_p10, %p564_p4 }
  0x21   : > { %p567_p12 = pnand %p566_p13, %p560_p7 }
  0x23   : > { %570 = shalt.err (!%p567_p12)
}
  0x24   : > { %481 = dma.hbm_to_vmem [thread:$0]  (!%p814_p0), %s174_s6, 128, %s177_s8, %s165_s10  }
  0x25   : > { %p832_p5 = pnand %p459_p1, %p200_p2  ;;  %s193_s5 = scalar_lea.hbm %s952_s1, %s456_s30 }
  0x26   : > { %s187_s7 = scalar_lea.vmem [#allocation5], %s455_s29  ;;  %s184_s18 = scalar_lea.sflag [#allocation6], %s805_s28 }
  0x27   : > { %s195_s11 = sshll.u32 %s187_s7, 4  ;;  %s716_s6 = smov [#allocation5]   ;;  %s196_s11 = int_to_ptr.vmem [resolvable:$true] %s195_s11 }
  0x28   : > { %s584_s19 = scalar_lea.vmem %s196_s11, 128  ;;  %s589_s8 = sshll.u32 %s716_s6, 4  ;;  %s590_s8 = int_to_ptr.vmem [resolvable:$false] %s589_s8 }
  0x29   : > { %p585_p12 = scmp.ne.s32.totalorder %s196_s11, %s584_s19  ;;  %s591_s10 = scalar_lea.vmem %s590_s8, 256 }
  0x2a   : > { %p592_p1 = scmp.lt.s32.totalorder %s196_s11, %s590_s8  ;;  %p593_p2 = scmp.lt.s32.totalorder %s591_s10, %s584_s19 }
  0x2b   : > { %p587_p6 = pnand %p585_p12, %p545_p3 }
  0x2c   : > { %p594_p4 = por %p593_p2, %p592_p1 }
  0x2d   : > { %p588_p7 = pneg %p587_p6 }
  0x2f   : > { %p595_p10 = pnand %p594_p4, %p588_p7 }
  0x31   : > { %598 = shalt.err (!%p595_p10)
}
  0x32   : > { %484 = dma.hbm_to_vmem [thread:$0]  (!%p814_p0), %s193_s5, 128, %s196_s11, %s184_s18  }
  0x33   : > { %204 = sbr.rel (%p832_p5) target bundleno = 106 (0x6a), region = 28  ;;  %s848_s28 = sand.u32 (!%p832_p5), 1, %s697_s13  }
  0x34   : > { %s851_s29 = sshll.u32 (!%p832_p5), %s848_s28, 3  ;;  %s207_s30 = scalar_lea.sflag (!%p832_p5), [#allocation3], %s848_s28 }
  0x35   : > { %s210_s21 = scalar_lea.vmem (!%p832_p5), [#allocation2], %s851_s29 }
  0x38   : > { %676 = dma.done.wait (%p787_p8), %s207_s30, 128  }
  0x39   : > { %678 = vsyncadd (%p787_p8), %s207_s30, 4294967168  ;;  %s216_s9 = scalar_lea.sflag [#allocation6], %s848_s28  ;;  %s219_s22 = scalar_lea.vmem [#allocation5], %s851_s29 }
  0x3a   : > { %680 = dma.done.wait (%p787_p8), %s216_s9, 128  }
  0x3b   : > { %682 = vsyncadd (%p787_p8), %s216_s9, 4294967168  ;;  %v258_v0 = vld [vmem:[%s210_s21] sm:$0xff]  ;;  %v259_v1 = vld [vmem:[%s219_s22] sm:$0xff]  ;;  %s466_s23 = sshll.u32 %s705_s15, 7  ;;  %s251_s4 = scalar_lea.vmem [#allocation8], %s851_s29  ;;  %v717_v7 = vmov 0.0  }
  0x3c   : > { %v266_v2 = vmax.f32 %v259_v1, 0.0  ;;  %v268_v3 = vmax.f32 %v258_v0, 0.0  ;;  %s316_s5 = sshll.u32 %s251_s4, 4  ;;  %s244_s24 = scalar_lea.vmem [#allocation7], %s851_s29  ;;  %s875_s5 = int_to_ptr.vmem [resolvable:$true] %s316_s5 }
  0x3d   : > { %s303_s7 = sshll.u32 %s244_s24, 4  ;;  %s873_s19 = scalar_lea.hbm %s954_s3, %s466_s23  ;;  %s882_s7 = int_to_ptr.vmem [resolvable:$true] %s303_s7 }
  0x3e   : > { %v267_v4 = vmin.f32 %v266_v2, 10.0  ;;  %v269_v5 = vmin.f32 %v268_v3, 10.0  ;;  %s880_s8 = scalar_lea.hbm %s953_s2, %s466_s23  ;;  %s290_s10 = scalar_lea.sflag [#allocation9], %s848_s28 }
  0x3f   : > { %s599_s30 = scalar_lea.vmem %s875_s5, 128  ;;  %s718_s21 = smov [#allocation8]  }
  0x40   : > { %vm270_vm0 = vcmp.gt.f32.partialorder %v267_v4, 0.0001  ;;  %v272_v6 = vsub.f32 %v269_v5, %v267_v4  ;;  %p600_p8 = scmp.ne.s32.totalorder %s875_s5, %s599_s30  ;;  %s603_s9 = sshll.u32 %s718_s21, 4  ;;  %s604_s9 = int_to_ptr.vmem [resolvable:$false] %s603_s9 }
  0x41   : > { %v275_v8 = vsel %vm270_vm0, 1.0, %v717_v7  ;;  %s605_s22 = scalar_lea.vmem %s604_s9, 256  ;;  %p606_p13 = scmp.lt.s32.totalorder %s875_s5, %s604_s9 }
  0x42   : > { %v273_v9 = vmul.f32 %v272_v6, %v272_v6  ;;  %283 = vst [vmem:[%s251_s4] sm:$0xff] %v275_v8  ;;  %p601_p0 = pnand %p600_p8, %p791_p9  ;;  %p607_p5 = scmp.lt.s32.totalorder %s605_s22, %s599_s30 }
  0x44   : > { %v274_v10 = vsel %vm270_vm0, %v273_v9, 0.0  ;;  %p602_p3 = pneg %p601_p0  ;;  %p608_p12 = por %p607_p5, %p606_p13 }
  0x46   : > { %p609_p6 = pnand %p608_p12, %p602_p3 }
  0x48   : > { %612 = shalt.err (!%p609_p6)
}
  0x49   : > { %s613_s23 = scalar_lea.hbm %s873_s19, 128  ;;  %s617_s18 = scalar_lea.hbm %s954_s3, 256 }
  0x4a   : > { %p614_p7 = scmp.ne.s32.totalorder %s873_s19, %s613_s23  ;;  %p618_p4 = scmp.lt.s32.totalorder %s873_s19, %s954_s3 }
  0x4b   : > { %p619_p10 = scmp.lt.s32.totalorder %s617_s18, %s613_s23 }
  0x4c   : > { %p615_p1 = pnand %p614_p7, %p791_p9 }
  0x4d   : > { %p620_p8 = por %p619_p10, %p618_p4 }
  0x4e   : > { %p616_p2 = pneg %p615_p1 }
  0x50   : > { %p621_p0 = pnand %p620_p8, %p616_p2 }
  0x52   : > { %624 = shalt.err (!%p621_p0)
}
  0x53   : > { %475 = dma.vmem_to_hbm [thread:$0]  (%p791_p9), %s875_s5, 128, %s873_s19, %s290_s10   ;;  %280 = vst [vmem:[%s244_s24] sm:$0xff] %v274_v10 }
  0x54   : > { %s285_s30 = scalar_lea.sflag [#allocation4], %s848_s28  ;;  %s625_s21 = scalar_lea.vmem %s882_s7, 128 }
  0x55   : > { %p626_p3 = scmp.ne.s32.totalorder %s882_s7, %s625_s21  ;;  %s719_s9 = smov [#allocation7]  }
  0x56   : > { %s629_s22 = sshll.u32 %s719_s9, 4  ;;  %s630_s22 = int_to_ptr.vmem [resolvable:$false] %s629_s22 }
  0x57   : > { %p627_p13 = pnand %p626_p3, %p791_p9  ;;  %s631_s23 = scalar_lea.vmem %s630_s22, 256 }
  0x58   : > { %p632_p12 = scmp.lt.s32.totalorder %s882_s7, %s630_s22  ;;  %p633_p6 = scmp.lt.s32.totalorder %s631_s23, %s625_s21 }
  0x59   : > { %p628_p5 = pneg %p627_p13 }
  0x5a   : > { %p634_p7 = por %p633_p6, %p632_p12 }
  0x5c   : > { %p635_p1 = pnand %p634_p7, %p628_p5 }
  0x5e   : > { %638 = shalt.err (!%p635_p1)
}
  0x5f   : > { %s639_s29 = scalar_lea.hbm %s880_s8, 128  ;;  %s643_s24 = scalar_lea.hbm %s953_s2, 256 }
  0x60   : > { %p640_p2 = scmp.ne.s32.totalorder %s880_s8, %s639_s29  ;;  %p644_p8 = scmp.lt.s32.totalorder %s880_s8, %s953_s2 }
  0x61   : > { %p645_p0 = scmp.lt.s32.totalorder %s643_s24, %s639_s29 }
  0x62   : > { %p641_p4 = pnand %p640_p2, %p791_p9 }
  0x63   : > { %p646_p3 = por %p645_p0, %p644_p8 }
  0x64   : > { %p642_p10 = pneg %p641_p4 }
  0x66   : > { %p647_p13 = pnand %p646_p3, %p642_p10 }
  0x68   : > { %650 = shalt.err (!%p647_p13)
}
  0x69   : > { %474 = dma.vmem_to_hbm [thread:$0]  (%p791_p9), %s882_s7, 128, %s880_s8, %s285_s30  }
  0x6a PF: > { %s328_s4 = sand.u32 1, %s693_s12   ;;  %p961_p5 = scmp.ge.s32.totalorder %s713_s17, 2 }
  0x6b   : > { %s329_s11 = scalar_lea.sflag [#allocation4], %s328_s4 }
  0x6c   : > { %p486_p12 = pnand %p961_p5, %p798_p11 }
  0x6e   : > { %p487_p6 = pneg %p486_p12 }
  0x70   : > { %684 = dma.done.wait (%p487_p6), %s329_s11, 128  }
  0x71   : > { %686 = vsyncadd (%p487_p6), %s329_s11, 4294967168  ;;  %s338_s18 = scalar_lea.sflag [#allocation9], %s328_s4 }
  0x72   : > { %688 = dma.done.wait (%p487_p6), %s338_s18, 128  }
  0x73   : > { %690 = vsyncadd (%p487_p6), %s338_s18, 4294967168  ;;  %s26_s17 = sadd.s32 1, %s713_s17   ;;  %s962_s12 = smov %s697_s13 }
  0x74   : > { %p23_p7 = scmp.ge.s32.totalorder %s26_s17, 4   ;;  %s963_s13 = smov %s701_s14 }
  0x75   : > { %s964_s14 = smov %s796_s26  ;;  %s965_s15 = smov %s709_s16 }
  0x76   : > { %s966_s16 = smov %s968_s20  ;;  %25 = sbr.rel (!%p23_p7) target bundleno = 10 (0xa), region = 107 }
  0x7b   :  { %343 = vsyncpa [#allocation3], 1 }
  0x7c   :  { %345 = vsyncpa [#allocation3 + $0x1], 1 }
  0x7d   :  { %346 = vsyncpa [#allocation6], 1 }
  0x7e   :  { %348 = vsyncpa [#allocation6 + $0x1], 1 }
  0x7f   :  { %349 = vsyncpa [#allocation4], 1 }
  0x80   :  { %351 = vsyncpa [#allocation4 + $0x1], 1 }
  0x81   :  { %352 = vsyncpa [#allocation9], 1 }
  0x82   :  { %354 = vsyncpa [#allocation9 + $0x1], 1 }

</bundles_post_ra>
